<compile_context>
chip_gen: v7x
topology: tpu7x:2x2x1
jax: 0.10.0
libtpu: 0.0.40
codegen_flags: <defaults>
</compile_context>

<pallas_src>
import functools

import jax
import jax.numpy as jnp
from jax.experimental import pallas as pl
from jax.experimental.pallas import tpu as pltpu

_BN_EPS = 1e-5
_LANE_TARGET = 2048  # target lane width per grid step


# ---------------------------------------------------------------------------
# pltpu.roll sign-convention self-check (one tiny kernel, cached, jit-safe).
# Guarantees the halo shifts below are correct regardless of the rotate
# direction the primitive uses.
# ---------------------------------------------------------------------------
@functools.lru_cache(maxsize=1)
def _pltpu_roll_is_like_jnp_roll() -> bool:
    def k(x_ref, o_ref):
        o_ref[...] = pltpu.roll(x_ref[...], shift=1, axis=1)

    with jax.ensure_compile_time_eval():
        x = jnp.arange(8 * 128, dtype=jnp.float32).reshape(8, 128)
        y = pl.pallas_call(k, out_shape=jax.ShapeDtypeStruct((8, 128), jnp.float32))(x)
        return bool(jnp.array_equal(y, jnp.roll(x, 1, axis=1)))


# ---------------------------------------------------------------------------
# Fused forward kernel: one grid step == `bt` batch elements, all layers inside.
# ---------------------------------------------------------------------------
def _fused_resnet_kernel(x_ref, w3_ref, s3_ref, wfc_ref, sfc_ref, o_ref,
                         im2col_ref, *, H, W, bt, nker, out_ch, nblk, residual,
                         roll_like_jnp, compute_dtype):
    HW = H * W
    lanes = bt * HW
    taps = [(dy, dx) for dy in (-1, 0, 1) for dx in (-1, 0, 1)]

    # lane -> (row, col) within its own image (cheap VPU iota / bit ops).
    lane = jax.lax.broadcasted_iota(jnp.int32, (1, lanes), 1)
    sp = lane & (HW - 1) if (HW & (HW - 1)) == 0 else lane % HW
    if (W & (W - 1)) == 0:  # power of two: bit ops, no integer division
        row = sp >> (W.bit_length() - 1)
        col = sp & (W - 1)
    else:
        row = sp // W
        col = sp - row * W

    # Precompute the 8 halo masks ONCE; every conv layer reuses them.
    masks = []
    for dy, dx in taps:
        if dy == 0 and dx == 0:
            masks.append(None)
            continue
        cond = None
        if dy < 0:
            cond = row >= -dy
        elif dy > 0:
            cond = row < H - dy
        if dx < 0:
            c = col >= -dx
            cond = c if cond is None else cond & c
        elif dx > 0:
            c = col < W - dx
            cond = c if cond is None else cond & c
        masks.append(cond)

    def conv3x3(act, layer, relu):
        # Build the (9*nker, lanes) im2col slab: one XLU lane-rotation + halo
        # mask per tap, written to sublane-aligned rows of the VMEM scratch.
        # Boundary wrap-around (including across stacked batch images) lands
        # only on lanes the masks zero out.
        for t, (dy, dx) in enumerate(taps):
            off = dy * W + dx
            if off == 0:
                tap = act
            else:
                shift = (-off if roll_like_jnp else off) % lanes
                tap = pltpu.roll(act, shift=shift, axis=1)
                tap = jnp.where(masks[t], tap, 0.0)
            im2col_ref[pl.ds(t * nker, nker), :] = tap.astype(compute_dtype)

        y = jnp.dot(w3_ref[layer], im2col_ref[...],     # (nker,9*nker)x(9*nker,lanes)
                    preferred_element_type=jnp.float32)
        y = y + s3_ref[layer]                           # folded bias/BN shift
        if relu:
            y = jnp.maximum(y, 0.0)
        return y

    act = x_ref[0].astype(jnp.float32)                  # (nker, lanes)

    # enc: conv3x3 + bias, no norm, ReLU
    act = conv3x3(act, 0, relu=True)
    # residual blocks: x + (conv+BN+ReLU -> conv+BN)
    for b in range(nblk):
        skip = act
        act = conv3x3(act, 1 + 2 * b, relu=True)
        act = conv3x3(act, 2 + 2 * b, relu=False) + skip
    # dec: conv3x3 + BN + ReLU
    act = conv3x3(act, 1 + 2 * nblk, relu=True)
    # fc: 1x1 conv == plain channel matmul + bias, no activation
    y = jnp.dot(wfc_ref[...], act.astype(compute_dtype),
                preferred_element_type=jnp.float32)
    y = y + sfc_ref[...]
    if residual:
        y = y + x_ref[0, :out_ch, :]
    o_ref[0] = y.astype(o_ref.dtype)


# ---------------------------------------------------------------------------
# Weight packing: fold conv bias + eval-mode BN into (scaled weight, shift).
# ---------------------------------------------------------------------------
def _fold_bn(bias, bn):
    if bn is None:
        return jnp.ones_like(bias), bias
    gamma, beta, mean, var = bn
    scale = gamma * jax.lax.rsqrt(var + _BN_EPS)
    shift = beta + scale * (bias - mean)
    return scale, shift


def _pack_conv3x3(p, nker, compute_dtype):
    """torch (Cout,Cin,3,3) conv (+BN) -> (nker, 9*nker) weight, (nker,1) shift."""
    w, b = p["w"], p["b"]
    cout, cin = w.shape[0], w.shape[1]
    scale, shift = _fold_bn(b, p["bn"])
    wt = jnp.transpose(w, (0, 2, 3, 1))                          # (Cout,kH,kW,Cin)
    wt = jnp.pad(wt, ((0, 0), (0, 0), (0, 0), (0, nker - cin)))  # pad Cin -> nker
    wmat = wt.reshape(cout, 9 * nker) * scale[:, None]           # fold BN scale
    return wmat.astype(compute_dtype), shift.reshape(cout, 1).astype(jnp.float32)


def _pack_conv1x1(p, compute_dtype):
    w, b = p["w"], p["b"]                                        # (Cout,Cin,1,1)
    scale, shift = _fold_bn(b, p["bn"])
    wmat = w.reshape(w.shape[0], w.shape[1]) * scale[:, None]
    return wmat.astype(compute_dtype), shift.reshape(-1, 1).astype(jnp.float32)


# ---------------------------------------------------------------------------
# Fused forward wrapper.
# ---------------------------------------------------------------------------
def resnet_forward_pallas(x_nchw, params, learning_type="plain",
                          compute_dtype=jnp.float32):
    """x_nchw: (N, in_channels, H, W) -> (N, out_channels, H, W)."""
    N, Cin, H, W = x_nchw.shape
    nker = params["enc"]["w"].shape[0]
    out_ch = params["fc"]["w"].shape[0]
    nblk = len(params["res"])
    HW = H * W
    residual = learning_type == "residual"
    if residual and Cin != out_ch:
        raise ValueError("residual learning_type needs in_channels == out_channels")
    # TODO(synk): in_channels > nker would need a wider first im2col slab.
    if Cin > nker:
        raise ValueError("in_channels > nker not supported by the fused kernel")

    # Batch tiling: stack `bt` images on the lane axis (lane-dense matmuls when
    # H*W is small); remaining batch tiles become a "parallel" grid axis.
    bt = 1
    for d in range(1, N + 1):
        if N % d == 0 and d * HW <= _LANE_TARGET:
            bt = d
    G = N // bt
    lanes = bt * HW

    # Channel-major, spatially flattened, batch-tiled input. Pad channels to
    # nker ONCE so every 3x3 layer (enc included) shares one weight shape.
    x = x_nchw.reshape(G, bt, Cin, HW).transpose(0, 2, 1, 3).reshape(G, Cin, lanes)
    x = jnp.pad(x, ((0, 0), (0, nker - Cin), (0, 0)))

    layers3 = ([params["enc"]] +
               [p for blk in params["res"] for p in blk] +
               [params["dec"]])
    packed = [_pack_conv3x3(p, nker, compute_dtype) for p in layers3]
    w3 = jnp.stack([w for w, _ in packed])                       # (L3, nker, 9*nker)
    s3 = jnp.stack([s for _, s in packed])                       # (L3, nker, 1)
    wfc, sfc = _pack_conv1x1(params["fc"], compute_dtype)        # (out, nker), (out, 1)
    L3 = w3.shape[0]

    kernel = functools.partial(
        _fused_resnet_kernel, H=H, W=W, bt=bt, nker=nker, out_ch=out_ch,
        nblk=nblk, residual=residual,
        roll_like_jnp=_pltpu_roll_is_like_jnp_roll(),
        compute_dtype=compute_dtype)

    out = pl.pallas_call(
        kernel,
        out_shape=jax.ShapeDtypeStruct((G, out_ch, lanes), x_nchw.dtype),
        grid_spec=pltpu.PrefetchScalarGridSpec(
            num_scalar_prefetch=0,
            grid=(G,),
            in_specs=[
                pl.BlockSpec((1, nker, lanes), lambda n: (n, 0, 0)),
                pl.BlockSpec((L3, nker, 9 * nker), lambda n: (0, 0, 0)),
                pl.BlockSpec((L3, nker, 1), lambda n: (0, 0, 0)),
                pl.BlockSpec((out_ch, nker), lambda n: (0, 0)),
                pl.BlockSpec((out_ch, 1), lambda n: (0, 0)),
            ],
            out_specs=pl.BlockSpec((1, out_ch, lanes), lambda n: (n, 0, 0)),
            scratch_shapes=[pltpu.VMEM((9 * nker, lanes), compute_dtype)],
        ),
        compiler_params=pltpu.CompilerParams(
            dimension_semantics=("parallel",),       # batch tiles split across TCs
            vmem_limit_bytes=32 * 1024 * 1024),      # explicit budget (<< usage here)
    )(x, w3, s3, wfc, sfc)

    out = out.reshape(G, out_ch, bt, HW).transpose(0, 2, 1, 3)
    return out.reshape(N, out_ch, H, W)


# ---------------------------------------------------------------------------
# Deterministic PyTorch-shaped parameter construction.
# ---------------------------------------------------------------------------
def _init_conv(key, cin, cout, k):
    kw, kb = jax.random.split(key)
    fan_in = cin * k * k
    w = jax.random.normal(kw, (cout, cin, k, k), jnp.float32) / jnp.sqrt(fan_in)
    b = 0.1 * jax.random.normal(kb, (cout,), jnp.float32)
    return w, b


def _init_bn(key, c):
    kg, kb = jax.random.split(key)
    gamma = 1.0 + 0.1 * jax.random.normal(kg, (c,), jnp.float32)
    beta = 0.1 * jax.random.normal(kb, (c,), jnp.float32)
    return gamma, beta, jnp.zeros((c,), jnp.float32), jnp.ones((c,), jnp.float32)


def init_resnet_params(key, in_channels, out_channels, nker, nblk, norm="bnorm"):
    keys = jax.random.split(key, 2 * nblk + 3)
    ki = iter(keys)

    def cbr(cin, cout, k, use_norm):
        kc, kn = jax.random.split(next(ki))
        w, b = _init_conv(kc, cin, cout, k)
        bn = _init_bn(kn, cout) if (use_norm and norm == "bnorm") else None
        return {"w": w, "b": b, "bn": bn, "k": k}

    return {
        "enc": cbr(in_channels, nker, 3, use_norm=False),
        "res": [(cbr(nker, nker, 3, True), cbr(nker, nker, 3, True))
                for _ in range(nblk)],
        "dec": cbr(nker, nker, 3, use_norm=True),
        "fc": cbr(nker, out_channels, 1, use_norm=False),
    }


# ---------------------------------------------------------------------------
# Pure-JAX NCHW reference (lax.conv), used only for the correctness check.
# ---------------------------------------------------------------------------
def _ref_cbr(x, p, relu):
    k = p["k"]
    pad = (k - 1) // 2
    y = jax.lax.conv_general_dilated(
        x, p["w"], window_strides=(1, 1), padding=[(pad, pad), (pad, pad)],
        dimension_numbers=("NCHW", "OIHW", "NCHW"))
    y = y + p["b"][None, :, None, None]
    if p["bn"] is not None:
        gamma, beta, mean, var = p["bn"]
        s = (gamma * jax.lax.rsqrt(var + _BN_EPS))[None, :, None, None]
        y = (y - mean[None, :, None, None]) * s + beta[None, :, None, None]
    if relu:
        y = jnp.maximum(y, 0.0)
    return y


def resnet_forward_ref(x, params, learning_type="plain"):
    x0 = x
    x = _ref_cbr(x, params["enc"], relu=True)
    for p1, p2 in params["res"]:
        y = _ref_cbr(x, p1, relu=True)
        x = x + _ref_cbr(y, p2, relu=False)
    x = _ref_cbr(x, params["dec"], relu=True)
    fc = _ref_cbr(x, params["fc"], relu=False)
    return fc if learning_type == "plain" else x0 + fc


if __name__ == "__main__":
    key = jax.random.PRNGKey(0)
    kp, kx = jax.random.split(key)

    # Small shapes consistent with ResNet(in_channels=4, out_channels=4,
    # nker=16, nblk=2) on a (2, 4, 16, 16) NCHW input.
    N, IN_C, OUT_C, H, W = 2, 4, 4, 16, 16
    NKER, NBLK = 16, 2

    params = init_resnet_params(kp, IN_C, OUT_C, NKER, NBLK)
    x = jax.random.normal(kx, (N, IN_C, H, W), jnp.float32)

    out = resnet_forward_pallas(x, params, learning_type="plain")
    out = jax.block_until_ready(out)
    assert out.shape == (N, OUT_C, H, W), out.shape

    ref = resnet_forward_ref(x, params, learning_type="plain")
    if not jnp.allclose(out, ref, rtol=1e-3, atol=1e-3):
        err = float(jnp.max(jnp.abs(out - ref)))
        raise AssertionError(f"Pallas ResNet mismatches JAX reference (max err {err})")

    print("KERNEL_OK")
</pallas_src>

<mosaic_0001>
module attributes {stable_mosaic.version = 11 : i64} {
  func.func @k(%arg0: memref<8x128xf32, #tpu.memory_space<vmem>>, %arg1: memref<8x128xf32, #tpu.memory_space<vmem>>) attributes {dimension_semantics = [], scalar_prefetch = 0 : i64, scratch_operands = 0 : i64, tpu.core_type = #tpu.core_type<tc>} {
    %c0 = arith.constant 0 : index
    %c0_0 = arith.constant 0 : index
    %0 = vector.load %arg0[%c0, %c0_0] : memref<8x128xf32, #tpu.memory_space<vmem>>, vector<8x128xf32>
    %c1_i32 = arith.constant 1 : i32
    %1 = tpu.dynamic_rotate %0 by %c1_i32 dim 1 : vector<8x128xf32>, i32 -> vector<8x128xf32>
    %c0_1 = arith.constant 0 : index
    %c0_2 = arith.constant 0 : index
    %2 = vector.load %arg1[%c0_1, %c0_2] : memref<8x128xf32, #tpu.memory_space<vmem>>, vector<8x128xf32>
    tpu.vector_store %arg1[%c0_1, %c0_2], %1 {strides = array<i32>} : memref<8x128xf32, #tpu.memory_space<vmem>>, vector<8x128xf32>,
    return
  }
}

</mosaic_0001>

<bundles_post_ra>
// kernel: tpu_custom_call.1
= control target key start
LH: loop header
LB: loop body
LE: loop exit
PB: predicated region body
PF: predicated region fallthrough
CT: control target
= control target key end

     0   :  { %6 = vsyncpa [#allocation3], 0  ;;  %s128_s0 = inlined_call_operand.hbm [shape: f32[8,128], index: 0, kind: input, shape index: {}]   ;;  %s129_s1 = inlined_call_operand.hbm [shape: f32[8,128], index: 1, kind: output, shape index: {}]  }
   0x1   :  { %7 = vsyncpa [#allocation4], 0  ;;  %s91_s6 = smov [#allocation2]   ;;  %s43_s10 = scalar_lea.hbm %s128_s0, 128 }
   0x2   :  { %s14_s7 = sshll.u32 %s91_s6, 4  ;;  %p44_p0 = scmp.ne.s32.totalorder %s128_s0, %s43_s10  ;;  %s15_s7 = int_to_ptr.vmem [resolvable:$true] %s14_s7 }
   0x3   :  { %p47_p1 = scmp.lt.u32.totalorder %s43_s10, %s128_s0 }
   0x5   :  { %p49_p2 = pnand %p47_p1, %p44_p0 }
   0x7   :  { %52 = shalt.err (!%p49_p2)
}
   0x8   :  { %s53_s15 = scalar_lea.vmem %s15_s7, 128  ;;  %p58_p4 = scmp.lt.s32.totalorder %s15_s7, %s15_s7 }
   0x9   :  { %p54_p3 = scmp.ne.s32.totalorder %s15_s7, %s53_s15  ;;  %p59_p5 = scmp.lt.s32.totalorder %s53_s15, %s53_s15 }
   0xb   :  { %p60_p6 = por %p59_p5, %p58_p4 }
   0xd   :  { %p61_p7 = pnand %p60_p6, %p54_p3 }
   0xf   :  { %64 = shalt.err (!%p61_p7)
}
  0x10   :  { %17 = dma.hbm_to_vmem [thread:$0]  %s128_s0, 128, %s15_s7, [#allocation3]  }
  0x11   :  { %87 = dma.done.wait [#allocation3], 128  }
  0x12   :  { %88 = vsyncadd [#allocation3], 4294967168  ;;  %v21_v0 = vld [vmem:[#allocation2] sm:$0xff]  ;;  %s92_s18 = smov 1   ;;  %s93_s19 = smov [#allocation5]  }
  0x13   :  { %22 = vrot.lane.b32.xlu0 %v21_v0, %s92_s18  ;;  %s31_s20 = sshll.u32 %s93_s19, 4  ;;  %s32_s20 = int_to_ptr.vmem [resolvable:$true] %s31_s20 }
  0x14   :  { %s65_s21 = scalar_lea.vmem %s32_s20, 128  ;;  %p70_p9 = scmp.lt.s32.totalorder %s32_s20, %s32_s20 }
  0x15   :  { %p66_p8 = scmp.ne.s32.totalorder %s32_s20, %s65_s21  ;;  %p71_p10 = scmp.lt.s32.totalorder %s65_s21, %s65_s21 }
  0x17   :  { %p72_p11 = por %p71_p10, %p70_p9 }
  0x19   :  { %p73_p12 = pnand %p72_p11, %p66_p8 }
  0x85   :  { %v23_v1 = vpop.permute.xlu0 %22 }
  0x86   :  { %24 = vst [vmem:[#allocation5] sm:$0xff] %v23_v1 }
  0x87   :  { %76 = shalt.err (!%p73_p12)
}
  0x88   :  { %s77_s0 = scalar_lea.hbm %s129_s1, 128 }
  0x89   :  { %p78_p13 = scmp.ne.s32.totalorder %s129_s1, %s77_s0  ;;  %p81_p0 = scmp.lt.u32.totalorder %s77_s0, %s129_s1 }
  0x8b   :  { %p83_p1 = pnand %p81_p0, %p78_p13 }
  0x8d   :  { %86 = shalt.err (!%p83_p1)
}
  0x8e   :  { %34 = dma.vmem_to_hbm [thread:$0]  %s32_s20, 128, %s129_s1, [#allocation4]  }
  0x8f   :  { %89 = dma.done.wait [#allocation4], 128  }
  0x90   :  { %90 = vsyncadd [#allocation4], 4294967168 }
  0x91   :  { %38 = vsyncpa [#allocation3], 1 }
  0x92   :  { %39 = vsyncpa [#allocation4], 1 }

</bundles_post_ra>
